<compile_context>
chip_gen: v6e
topology: v6e:2x2x1
jax: 0.10.0
libtpu: 0.0.40
codegen_flags: <defaults>
</compile_context>

<pallas_src>
import math

import jax
import jax.numpy as jnp
from jax.experimental import pallas as pl
from jax.experimental.pallas import tpu as pltpu

LN_EPS = 1e-5


# ----------------------------- Pallas kernel --------------------------------
def _patch_merge_kernel(x_ref, w_ref, b_ref, o_ref):
    # x_ref: (TS, D) f32   w_ref: (D, OUT) bf16 (gamma folded in)
    # b_ref: (1, OUT) f32 (beta @ W^T)          o_ref: (TS, OUT) f32
    x = x_ref[...]                                        # f32 already
    inv_d = 1.0 / x.shape[-1]
    s1 = jnp.sum(x, axis=-1, keepdims=True)               # one-pass stats
    s2 = jnp.sum(x * x, axis=-1, keepdims=True)
    mean = s1 * inv_d
    var = jnp.maximum(s2 * inv_d - mean * mean, 0.0)       # biased var (nn.LayerNorm)
    xn = (x - mean) * jax.lax.rsqrt(var + LN_EPS)          # (TS, D) f32
    acc = jnp.dot(xn.astype(jnp.bfloat16), w_ref[...],
                  preferred_element_type=jnp.float32)      # MXU bf16, f32 accum
    o_ref[...] = (acc + b_ref[...]).astype(o_ref.dtype)


def _fused_norm_linear(feats_rows, gamma, beta, w_t, *, row_tile=256):
    """feats_rows: (R, D) rows = flattened (batch * spatial); returns (R, OUT) f32."""
    R, D = feats_rows.shape
    OUT = w_t.shape[1]

    # Fold the LayerNorm affine into the linear weight / a bias term.
    w_folded = (gamma[:, None] * w_t).astype(jnp.bfloat16)          # (D, OUT)
    bias_folded = (beta @ w_t).reshape(1, OUT).astype(jnp.float32)  # (1, OUT)

    ts = row_tile
    n_tiles = pl.cdiv(R, ts)
    r_pad = n_tiles * ts
    if r_pad != R:
        feats_rows = jnp.pad(feats_rows, ((0, r_pad - R), (0, 0)))

    out = pl.pallas_call(
        _patch_merge_kernel,
        out_shape=jax.ShapeDtypeStruct((r_pad, OUT), jnp.float32),
        grid=(n_tiles,),
        in_specs=[
            pl.BlockSpec((ts, D), lambda i: (i, 0)),
            pl.BlockSpec((D, OUT), lambda i: (0, 0)),
            pl.BlockSpec((1, OUT), lambda i: (0, 0)),
        ],
        out_specs=pl.BlockSpec((ts, OUT), lambda i: (i, 0)),
        compiler_params=pltpu.CompilerParams(
            dimension_semantics=("parallel",),
            vmem_limit_bytes=32 * 1024 * 1024),
    )(feats_rows, w_folded, bias_folded)
    return out[:R]


# ------------------------------- glue (JAX) ----------------------------------
def _unfold_nchw(x4, df):
    """Exactly nn.Unfold(kernel_size=df, stride=df, padding=0) on an NCHW tensor."""
    N, C, H, W = x4.shape
    oh, ow = H // df, W // df
    x6 = x4.reshape(N, C, oh, df, ow, df)
    y = jnp.transpose(x6, (0, 1, 3, 5, 2, 4))             # (N, C, df, df, oh, ow)
    return y.reshape(N, C * df * df, oh * ow)


def _make_feats(x, input_resolution, df):
    """(b, l, c) -> (b, S, D) with S = new_h*new_w, D = c*df*df, matching PyTorch."""
    b, l, c = x.shape
    h, w = input_resolution
    new_h, new_w = h // df, w // df
    x4 = x.reshape(b, h, w, c)
    # NOTE: the PyTorch module hands this (b, h, w, c) view to nn.Unfold, which
    # interprets it as NCHW (channels=h, spatial=(w, c)).  Reproduced verbatim.
    y = _unfold_nchw(x4, df)                               # (b, h*df*df, (w//df)*(c//df))
    z = y.reshape(b, -1, new_h, new_w)                     # (b, c*df*df, new_h, new_w)
    z = jnp.transpose(z, (0, 2, 3, 1))                     # (b, new_h, new_w, c*df*df)
    return z.reshape(b, new_h * new_w, c * df * df)        # (b, S, D)


def patch_merging_forward(x, params, input_resolution, downscaling_factor=2,
                          *, row_tile=256):
    """x: (b, l, c) with l = h*w, matching the PyTorch forward exactly."""
    df = downscaling_factor
    feats = _make_feats(x, input_resolution, df)           # (b, S, D)
    b, S, D = feats.shape
    OUT = params["w_t"].shape[1]
    # Flatten batch+spatial rows so the kernel tiles a single dense row axis.
    rows = feats.reshape(b * S, D)
    out_rows = _fused_norm_linear(rows, params["gamma"], params["beta"],
                                  params["w_t"], row_tile=row_tile)
    return out_rows.reshape(b, S, OUT)


# -------------------------------- reference ----------------------------------
def _reference(feats, gamma, beta, w_t):
    mean = jnp.mean(feats, axis=-1, keepdims=True)
    var = jnp.mean((feats - mean) ** 2, axis=-1, keepdims=True)
    xn = (feats - mean) / jnp.sqrt(var + LN_EPS)
    return (xn * gamma + beta) @ w_t


if __name__ == "__main__":
    # Small shapes consistent with the module.
    batch = 2
    in_channels = 4
    input_resolution = (16, 16)
    downscaling_factor = 2
    out_channels = 8

    h, w = input_resolution
    l = h * w
    D = in_channels * downscaling_factor ** 2

    key = jax.random.PRNGKey(0)
    kx, kg, kb, kw = jax.random.split(key, 4)

    x = jax.random.normal(kx, (batch, l, in_channels), dtype=jnp.float32)

    # Deterministic synthetic parameters (not a checkpoint load).
    params = {
        "gamma": 1.0 + 0.1 * jax.random.normal(kg, (D,), dtype=jnp.float32),
        "beta": 0.1 * jax.random.normal(kb, (D,), dtype=jnp.float32),
        # nn.Linear weight is (out, in); we store its transpose for x @ W^T.
        "w_t": (jax.random.normal(kw, (out_channels, D), dtype=jnp.float32)
                / math.sqrt(D)).T,
    }

    # Plain-JAX reference for the fused hot path (f32 end-to-end).
    feats = _make_feats(x, input_resolution, downscaling_factor)
    ref = _reference(feats, params["gamma"], params["beta"], params["w_t"])

    # Run once with the default tile (exercises the row-padding path: 128 -> 256)
    out = patch_merging_forward(x, params, input_resolution, downscaling_factor)
    out = jax.block_until_ready(out)
    # ... and once with a smaller tile (exercises the multi-step grid, no padding).
    out_small = patch_merging_forward(x, params, input_resolution,
                                      downscaling_factor, row_tile=64)
    out_small = jax.block_until_ready(out_small)

    S = (h // downscaling_factor) * (w // downscaling_factor)
    assert out.shape == (batch, S, out_channels)
    assert out_small.shape == (batch, S, out_channels)
    # bf16 MXU path -> loosened tolerance vs the f32 reference.
    assert jnp.allclose(out, ref, atol=3e-2, rtol=3e-2)
    assert jnp.allclose(out_small, ref, atol=3e-2, rtol=3e-2)
    assert jnp.allclose(out, out_small, atol=1e-5, rtol=1e-5)

    print("KERNEL_OK")
</pallas_src>

<mosaic_0001>
module attributes {stable_mosaic.version = 11 : i64} {
  func.func @_patch_merge_kernel(%arg0: i32, %arg1: memref<256x16xf32, #tpu.memory_space<vmem>>, %arg2: memref<16x8xbf16, #tpu.memory_space<vmem>>, %arg3: memref<1x8xf32, #tpu.memory_space<vmem>>, %arg4: memref<256x8xf32, #tpu.memory_space<vmem>>) attributes {dimension_semantics = [#tpu.dimension_semantics<parallel>], iteration_bounds = array<i64: 1>, scalar_prefetch = 0 : i64, scratch_operands = 0 : i64, tpu.core_type = #tpu.core_type<tc>, window_params = [{transform_indices = @transform_0, window_bounds = array<i64: 256, 16>}, {pipeline_mode = #tpu.pipeline_mode<synchronous>, transform_indices = @transform_1, window_bounds = array<i64: 16, 8>}, {pipeline_mode = #tpu.pipeline_mode<synchronous>, transform_indices = @transform_2, window_bounds = array<i64: 1, 8>}, {transform_indices = @transform_3, window_bounds = array<i64: 256, 8>}]} {
    %c0 = arith.constant 0 : index
    %c0_0 = arith.constant 0 : index
    %0 = vector.load %arg1[%c0, %c0_0] : memref<256x16xf32, #tpu.memory_space<vmem>>, vector<256x16xf32>
    %cst = arith.constant dense<0.000000e+00> : vector<256xf32>
    %1 = vector.multi_reduction <add>, %0, %cst [1] : vector<256x16xf32> to vector<256xf32>
    %2 = vector.shape_cast %1 : vector<256xf32> to vector<256x1xf32>
    %3 = arith.mulf %0, %0 : vector<256x16xf32>
    %cst_1 = arith.constant dense<0.000000e+00> : vector<256xf32>
    %4 = vector.multi_reduction <add>, %3, %cst_1 [1] : vector<256x16xf32> to vector<256xf32>
    %5 = vector.shape_cast %4 : vector<256xf32> to vector<256x1xf32>
    %cst_2 = arith.constant 6.250000e-02 : f32
    %6 = vector.broadcast %cst_2 : f32 to vector<256x1xf32>
    %7 = arith.mulf %2, %6 : vector<256x1xf32>
    %cst_3 = arith.constant 6.250000e-02 : f32
    %8 = vector.broadcast %cst_3 : f32 to vector<256x1xf32>
    %9 = arith.mulf %5, %8 : vector<256x1xf32>
    %10 = arith.mulf %7, %7 : vector<256x1xf32>
    %11 = arith.subf %9, %10 : vector<256x1xf32>
    %cst_4 = arith.constant 0.000000e+00 : f32
    %12 = vector.broadcast %cst_4 : f32 to vector<256x1xf32>
    %13 = arith.maximumf %11, %12 : vector<256x1xf32>
    %14 = vector.broadcast %7 : vector<256x1xf32> to vector<256x16xf32>
    %15 = arith.subf %0, %14 : vector<256x16xf32>
    %cst_5 = arith.constant 9.99999974E-6 : f32
    %16 = vector.broadcast %cst_5 : f32 to vector<256x1xf32>
    %17 = arith.addf %13, %16 : vector<256x1xf32>
    %18 = math.rsqrt %17 : vector<256x1xf32>
    %19 = vector.broadcast %18 : vector<256x1xf32> to vector<256x16xf32>
    %20 = arith.mulf %15, %19 : vector<256x16xf32>
    %21 = arith.truncf %20 : vector<256x16xf32> to vector<256x16xbf16>
    %c0_6 = arith.constant 0 : index
    %c0_7 = arith.constant 0 : index
    %22 = vector.load %arg2[%c0_6, %c0_7] : memref<16x8xbf16, #tpu.memory_space<vmem>>, vector<16x8xbf16>
    %cst_8 = arith.constant dense<0.000000e+00> : vector<256x8xf32>
    %23 = tpu.matmul %21, %22, %cst_8 {dimension_numbers = #tpu.dot_dimension_numbers<[1], [0], [0], [1], [0, 0, 1, 1], [], []>} : vector<256x16xbf16>, vector<16x8xbf16>, vector<256x8xf32> -> vector<256x8xf32>
    %c0_9 = arith.constant 0 : index
    %c0_10 = arith.constant 0 : index
    %24 = vector.load %arg3[%c0_9, %c0_10] : memref<1x8xf32, #tpu.memory_space<vmem>>, vector<1x8xf32>
    %25 = vector.broadcast %24 : vector<1x8xf32> to vector<256x8xf32>
    %26 = arith.addf %23, %25 : vector<256x8xf32>
    %c0_11 = arith.constant 0 : index
    %c0_12 = arith.constant 0 : index
    %27 = vector.load %arg4[%c0_11, %c0_12] : memref<256x8xf32, #tpu.memory_space<vmem>>, vector<256x8xf32>
    tpu.vector_store %arg4[%c0_11, %c0_12], %26 {strides = array<i32>} : memref<256x8xf32, #tpu.memory_space<vmem>>, vector<256x8xf32>,
    return
  }
  func.func @transform_0(%arg0: i32) -> (i32, i32) {
    %c0_i32 = arith.constant 0 : i32
    %c0_i32_0 = arith.constant 0 : i32
    return %arg0, %c0_i32 : i32, i32
  }
  func.func @transform_1(%arg0: i32) -> (i32, i32) {
    %c0_i32 = arith.constant 0 : i32
    %c0_i32_0 = arith.constant 0 : i32
    %c0_i32_1 = arith.constant 0 : i32
    return %c0_i32, %c0_i32_0 : i32, i32
  }
  func.func @transform_2(%arg0: i32) -> (i32, i32) {
    %c0_i32 = arith.constant 0 : i32
    %c0_i32_0 = arith.constant 0 : i32
    %c0_i32_1 = arith.constant 0 : i32
    return %c0_i32, %c0_i32_0 : i32, i32
  }
  func.func @transform_3(%arg0: i32) -> (i32, i32) {
    %c0_i32 = arith.constant 0 : i32
    %c0_i32_0 = arith.constant 0 : i32
    return %arg0, %c0_i32 : i32, i32
  }
}

</mosaic_0001>

<bundles_post_ra>
// kernel: tpu_custom_call.1
= control target key start
LH: loop header
LB: loop body
LE: loop exit
PB: predicated region body
PF: predicated region fallthrough
CT: control target
= control target key end

     0   :  { %vm47_vm0 = vcmask 130048   ;;  %vm800_vm1 = vcmask 64512   ;;  %s1689_s0 = inlined_call_operand.vmem [shape: f32[256,16], index: 0, kind: input, shape index: {}]   ;;  %s1690_s1 = inlined_call_operand.vmem [shape: bf16[16,8], index: 1, kind: input, shape index: {}]   ;;  %s1691_s2 = inlined_call_operand.vmem [shape: f32[1,8], index: 2, kind: input, shape index: {}]   ;;  %s1692_s3 = inlined_call_operand.vmem [shape: f32[256,8], index: 3, kind: output, shape index: {}]  }
   0x1   :  { %v996_v0 = vld [vmem:[%s1689_s0 + $0x80] sm:$0xff]  ;;  %v1006_v2 = vld [vmem:[%s1689_s0 + $0x88] sm:$0xff]  ;;  %v1024_v8 = vld [vmem:[%s1689_s0 + $0x18] sm:$0xff] }
   0x2   :  { %v1001_v1 = vld [vmem:[%s1689_s0] sm:$0xff]  ;;  %v96_v3 = vsel %vm47_vm0, %v996_v0, 0.0  ;;  %v1015_v5 = vld [vmem:[%s1689_s0 + $0x8] sm:$0xff]  ;;  %v99_v6 = vsel %vm47_vm0, %v1006_v2, 0.0  ;;  %v1029_v9 = vld [vmem:[%s1689_s0 + $0x10] sm:$0xff]  ;;  %v57_v10 = vsel %vm47_vm0, %v1024_v8, 0.0  ;;  %v161_v20 = vmul.f32 %v1006_v2, %v1006_v2 }
   0x3   :  { %v48_v4 = vsel %vm47_vm0, %v1001_v1, 0.0  ;;  %97 = vadd.xlane.f32.xlu1 %v96_v3  ;;  %v51_v7 = vsel %vm47_vm0, %v1015_v5, 0.0  ;;  %v54_v11 = vsel %vm47_vm0, %v1029_v9, 0.0  ;;  %v1038_v12 = vld [vmem:[%s1689_s0 + $0x98] sm:$0xff]  ;;  %v1043_v13 = vld [vmem:[%s1689_s0 + $0x90] sm:$0xff]  ;;  %v145_v16 = vmul.f32 %v1015_v5, %v1015_v5  ;;  %v1076_v32 = vld [vmem:[%s1689_s0 + $0x28] sm:$0xff] }
   0x4   :  { %49 = vadd.xlane.f32.xlu0 %v48_v4  ;;  %v105_v14 = vsel %vm47_vm0, %v1038_v12, 0.0  ;;  %v102_v15 = vsel %vm47_vm0, %v1043_v13, 0.0  ;;  %v144_v17 = vmul.f32 %v1001_v1, %v1001_v1  ;;  %v160_v21 = vmul.f32 %v996_v0, %v996_v0  ;;  %v1081_v33 = vld [vmem:[%s1689_s0 + $0x20] sm:$0xff]  ;;  %v1090_v36 = vld [vmem:[%s1689_s0 + $0xa8] sm:$0xff]  ;;  %v1104_v40 = vld [vmem:[%s1689_s0 + $0x38] sm:$0xff] }
   0x5   :  { %v179_v18 = vsel %vm47_vm0, %v145_v16, 0.0  ;;  %v227_v22 = vsel %vm47_vm0, %v161_v20, 0.0  ;;  %v147_v24 = vmul.f32 %v1024_v8, %v1024_v8  ;;  %v146_v25 = vmul.f32 %v1029_v9, %v1029_v9  ;;  %v1095_v37 = vld [vmem:[%s1689_s0 + $0xa0] sm:$0xff]  ;;  %v1109_v41 = vld [vmem:[%s1689_s0 + $0x30] sm:$0xff]  ;;  %v1118_v44 = vld [vmem:[%s1689_s0 + $0xb8] sm:$0xff] }
   0x6   :  { %v176_v19 = vsel %vm47_vm0, %v144_v17, 0.0  ;;  %v224_v23 = vsel %vm47_vm0, %v160_v21, 0.0  ;;  %v163_v28 = vmul.f32 %v1038_v12, %v1038_v12  ;;  %v162_v29 = vmul.f32 %v1043_v13, %v1043_v13  ;;  %v1123_v45 = vld [vmem:[%s1689_s0 + $0xb0] sm:$0xff]  ;;  %v908_v62 = vld [vmem:[%s1690_s1] sm:$0xff]   ;;  %v1159_v4 = vld [vmem:[%s1689_s0 + $0x48] sm:$0xff] }
   0x7   :  { %100 = vadd.xlane.f32.xlu1 %v99_v6  ;;  %v185_v26 = vsel %vm47_vm0, %v147_v24, 0.0  ;;  %v182_v27 = vsel %vm47_vm0, %v146_v25, 0.0  ;;  %v63_v34 = vsel %vm47_vm0, %v1076_v32, 0.0  ;;  %v60_v35 = vsel %vm47_vm0, %v1081_v33, 0.0  ;;  %872 = vmatprep.subr.bf16.mxu0 %v908_v62  ;;  %v1164_v6 = vld [vmem:[%s1689_s0 + $0x40] sm:$0xff]  ;;  %v1187_v17 = vld [vmem:[%s1689_s0 + $0x58] sm:$0xff] }
   0x8   :  { %52 = vadd.xlane.f32.xlu0 %v51_v7  ;;  %v233_v30 = vsel %vm47_vm0, %v163_v28, 0.0  ;;  %v230_v31 = vsel %vm47_vm0, %v162_v29, 0.0  ;;  %v111_v38 = vsel %vm47_vm0, %v1090_v36, 0.0  ;;  %v108_v39 = vsel %vm47_vm0, %v1095_v37, 0.0  ;;  %906 = vmatprep.subr.bf16.mxu1 %v908_v62  ;;  %v1201_v21 = vld [vmem:[%s1689_s0 + $0xd8] sm:$0xff] }
   0x9   :  { %v69_v42 = vsel %vm47_vm0, %v1104_v40, 0.0  ;;  %v66_v43 = vsel %vm47_vm0, %v1109_v41, 0.0  ;;  %v117_v46 = vsel %vm47_vm0, %v1118_v44, 0.0  ;;  %v114_v47 = vsel %vm47_vm0, %v1123_v45, 0.0  ;;  %873 = vmatpush3.bf16.msra.mxu0 %v908_v62  ;;  %907 = vmatpush3.bf16.msra.mxu1 %v908_v62  ;;  %v1286_v62 = vld [vmem:[%s1689_s0 + $0xf0] sm:$0xff] }
   0xa   :  { %v149_v48 = vmul.f32 %v1076_v32, %v1076_v32  ;;  %v148_v49 = vmul.f32 %v1081_v33, %v1081_v33  ;;  %v165_v52 = vmul.f32 %v1090_v36, %v1090_v36  ;;  %v164_v53 = vmul.f32 %v1095_v37, %v1095_v37 }
   0xb   :  { %58 = vadd.xlane.f32.xlu1 %v57_v10  ;;  %v151_v56 = vmul.f32 %v1104_v40, %v1104_v40  ;;  %v150_v57 = vmul.f32 %v1109_v41, %v1109_v41  ;;  %v167_v60 = vmul.f32 %v1118_v44, %v1118_v44  ;;  %v166_v61 = vmul.f32 %v1123_v45, %v1123_v45 }
   0xc   :  { %55 = vadd.xlane.f32.xlu0 %v54_v11  ;;  %v191_v50 = vsel %vm47_vm0, %v149_v48, 0.0  ;;  %v188_v51 = vsel %vm47_vm0, %v148_v49, 0.0  ;;  %v239_v54 = vsel %vm47_vm0, %v165_v52, 0.0  ;;  %v236_v55 = vsel %vm47_vm0, %v164_v53, 0.0  ;;  %v1173_v11 = vld [vmem:[%s1689_s0 + $0xc8] sm:$0xff] }
   0xd   :  { %v197_v58 = vsel %vm47_vm0, %v151_v56, 0.0  ;;  %v194_v59 = vsel %vm47_vm0, %v150_v57, 0.0  ;;  %v245_v63 = vsel %vm47_vm0, %v167_v60, 0.0  ;;  %v242_v3 = vsel %vm47_vm0, %v166_v61, 0.0  ;;  %v1239_v49 = vld [vmem:[%s1689_s0 + $0x68] sm:$0xff]  ;;  %v1267_v57 = vld [vmem:[%s1689_s0 + $0x78] sm:$0xff] }
   0xe   :  { %v75_v7 = vsel %vm47_vm0, %v1159_v4, 0.0  ;;  %v72_v10 = vsel %vm47_vm0, %v1164_v6, 0.0  ;;  %v153_v25 = vmul.f32 %v1159_v4, %v1159_v4  ;;  %v169_v29 = vmul.f32 %v1173_v11, %v1173_v11  ;;  %v1253_v53 = vld [vmem:[%s1689_s0 + $0xe8] sm:$0xff]  ;;  %v1281_v61 = vld [vmem:[%s1689_s0 + $0xf8] sm:$0xff] }
   0xf   :  { %106 = vadd.xlane.f32.xlu1 %v105_v14  ;;  %v1178_v14 = vld [vmem:[%s1689_s0 + $0xc0] sm:$0xff] }
  0x10   :  { %103 = vadd.xlane.f32.xlu0 %v102_v15  ;;  %v123_v15 = vsel %vm47_vm0, %v1173_v11, 0.0  ;;  %v120_v16 = vsel %vm47_vm0, %v1178_v14, 0.0 }
  0x13   :  { %180 = vadd.xlane.f32.xlu1 %v179_v18  ;;  %v1192_v18 = vld [vmem:[%s1689_s0 + $0x50] sm:$0xff] }
  0x14   :  { %177 = vadd.xlane.f32.xlu0 %v176_v19  ;;  %v81_v19 = vsel %vm47_vm0, %v1187_v17, 0.0  ;;  %v78_v20 = vsel %vm47_vm0, %v1192_v18, 0.0 }
  0x17   :  { %228 = vadd.xlane.f32.xlu1 %v227_v22  ;;  %v1206_v22 = vld [vmem:[%s1689_s0 + $0xd0] sm:$0xff] }
  0x18   :  { %225 = vadd.xlane.f32.xlu0 %v224_v23  ;;  %v129_v23 = vsel %vm47_vm0, %v1201_v21, 0.0  ;;  %v126_v24 = vsel %vm47_vm0, %v1206_v22, 0.0 }
  0x1b   :  { %186 = vadd.xlane.f32.xlu1 %v185_v26  ;;  %v152_v26 = vmul.f32 %v1164_v6, %v1164_v6 }
  0x1c   :  { %183 = vadd.xlane.f32.xlu0 %v182_v27  ;;  %v203_v27 = vsel %vm47_vm0, %v153_v25, 0.0  ;;  %v159_v25 = vmul.f32 %v1267_v57, %v1267_v57 }
  0x1d   :  { %v200_v28 = vsel %vm47_vm0, %v152_v26, 0.0 }
  0x1f   :  { %234 = vadd.xlane.f32.xlu1 %v233_v30  ;;  %v168_v30 = vmul.f32 %v1178_v14, %v1178_v14 }
  0x20   :  { %231 = vadd.xlane.f32.xlu0 %v230_v31  ;;  %v251_v31 = vsel %vm47_vm0, %v169_v29, 0.0  ;;  %v175_v29 = vmul.f32 %v1281_v61, %v1281_v61 }
  0x23   :  { %64 = vadd.xlane.f32.xlu1 %v63_v34  ;;  %v248_v34 = vsel %vm47_vm0, %v168_v30, 0.0  ;;  %v174_v30 = vmul.f32 %v1286_v62, %v1286_v62 }
  0x24   :  { %61 = vadd.xlane.f32.xlu0 %v60_v35  ;;  %v155_v35 = vmul.f32 %v1187_v17, %v1187_v17 }
  0x27   :  { %112 = vadd.xlane.f32.xlu1 %v111_v38  ;;  %v154_v38 = vmul.f32 %v1192_v18, %v1192_v18 }
  0x28   :  { %109 = vadd.xlane.f32.xlu0 %v108_v39  ;;  %v209_v39 = vsel %vm47_vm0, %v155_v35, 0.0 }
  0x2b   :  { %70 = vadd.xlane.f32.xlu1 %v69_v42  ;;  %v206_v42 = vsel %vm47_vm0, %v154_v38, 0.0 }
  0x2c   :  { %67 = vadd.xlane.f32.xlu0 %v66_v43  ;;  %v171_v43 = vmul.f32 %v1201_v21, %v1201_v21 }
  0x2f   :  { %118 = vadd.xlane.f32.xlu1 %v117_v46  ;;  %v170_v46 = vmul.f32 %v1206_v22, %v1206_v22 }
  0x30   :  { %115 = vadd.xlane.f32.xlu0 %v114_v47  ;;  %v257_v47 = vsel %vm47_vm0, %v171_v43, 0.0 }
  0x31   :  { %v254_v48 = vsel %vm47_vm0, %v170_v46, 0.0 }
  0x33   :  { %192 = vadd.xlane.f32.xlu1 %v191_v50  ;;  %v1244_v50 = vld [vmem:[%s1689_s0 + $0x60] sm:$0xff] }
  0x34   :  { %189 = vadd.xlane.f32.xlu0 %v188_v51  ;;  %v87_v51 = vsel %vm47_vm0, %v1239_v49, 0.0  ;;  %v84_v52 = vsel %vm47_vm0, %v1244_v50, 0.0 }
  0x37   :  { %240 = vadd.xlane.f32.xlu1 %v239_v54  ;;  %v1258_v54 = vld [vmem:[%s1689_s0 + $0xe0] sm:$0xff] }
  0x38   :  { %237 = vadd.xlane.f32.xlu0 %v236_v55  ;;  %v135_v55 = vsel %vm47_vm0, %v1253_v53, 0.0  ;;  %v132_v56 = vsel %vm47_vm0, %v1258_v54, 0.0 }
  0x3b   :  { %198 = vadd.xlane.f32.xlu1 %v197_v58  ;;  %v1272_v58 = vld [vmem:[%s1689_s0 + $0x70] sm:$0xff] }
  0x3c   :  { %195 = vadd.xlane.f32.xlu0 %v194_v59  ;;  %v93_v59 = vsel %vm47_vm0, %v1267_v57, 0.0  ;;  %v90_v60 = vsel %vm47_vm0, %v1272_v58, 0.0  ;;  %v158_v26 = vmul.f32 %v1272_v58, %v1272_v58 }
  0x3f   :  { %246 = vadd.xlane.f32.xlu1 %v245_v63  ;;  %v141_v63 = vsel %vm47_vm0, %v1281_v61, 0.0 }
  0x40   :  { %243 = vadd.xlane.f32.xlu0 %v242_v3  ;;  %v138_v3 = vsel %vm47_vm0, %v1286_v62, 0.0 }
  0x43   :  { %76 = vadd.xlane.f32.xlu1 %v75_v7  ;;  %v157_v7 = vmul.f32 %v1239_v49, %v1239_v49 }
  0x44   :  { %73 = vadd.xlane.f32.xlu0 %v72_v10  ;;  %v156_v10 = vmul.f32 %v1244_v50, %v1244_v50 }
  0x47   :  { %124 = vadd.xlane.f32.xlu1 %v123_v15  ;;  %v215_v15 = vsel %vm47_vm0, %v157_v7, 0.0 }
  0x48   :  { %121 = vadd.xlane.f32.xlu0 %v120_v16  ;;  %v212_v16 = vsel %vm47_vm0, %v156_v10, 0.0 }
  0x4b   :  { %82 = vadd.xlane.f32.xlu1 %v81_v19  ;;  %v173_v19 = vmul.f32 %v1253_v53, %v1253_v53 }
  0x4c   :  { %79 = vadd.xlane.f32.xlu0 %v78_v20  ;;  %v172_v20 = vmul.f32 %v1258_v54, %v1258_v54 }
  0x4f   :  { %130 = vadd.xlane.f32.xlu1 %v129_v23  ;;  %v263_v23 = vsel %vm47_vm0, %v173_v19, 0.0 }
  0x50   :  { %127 = vadd.xlane.f32.xlu0 %v126_v24  ;;  %v260_v24 = vsel %vm47_vm0, %v172_v20, 0.0 }
  0x53   :  { %204 = vadd.xlane.f32.xlu1 %v203_v27  ;;  %v221_v27 = vsel %vm47_vm0, %v159_v25, 0.0 }
  0x54   :  { %201 = vadd.xlane.f32.xlu0 %v200_v28  ;;  %v218_v28 = vsel %vm47_vm0, %v158_v26, 0.0 }
  0x57   :  { %252 = vadd.xlane.f32.xlu1 %v251_v31  ;;  %v269_v31 = vsel %vm47_vm0, %v175_v29, 0.0 }
  0x58   :  { %249 = vadd.xlane.f32.xlu0 %v248_v34  ;;  %v266_v34 = vsel %vm47_vm0, %v174_v30, 0.0 }
  0x5b   :  { %210 = vadd.xlane.f32.xlu1 %v209_v39 }
  0x5c   :  { %207 = vadd.xlane.f32.xlu0 %v206_v42 }
  0x5f   :  { %258 = vadd.xlane.f32.xlu1 %v257_v47 }
  0x60   :  { %255 = vadd.xlane.f32.xlu0 %v254_v48 }
  0x63   :  { %88 = vadd.xlane.f32.xlu1 %v87_v51 }
  0x64   :  { %85 = vadd.xlane.f32.xlu0 %v84_v52 }
  0x67   :  { %136 = vadd.xlane.f32.xlu1 %v135_v55 }
  0x68   :  { %133 = vadd.xlane.f32.xlu0 %v132_v56 }
  0x6b   :  { %94 = vadd.xlane.f32.xlu1 %v93_v59 }
  0x6c   :  { %91 = vadd.xlane.f32.xlu0 %v90_v60 }
  0x6f   :  { %142 = vadd.xlane.f32.xlu1 %v141_v63 }
  0x70   :  { %139 = vadd.xlane.f32.xlu0 %v138_v3 }
  0x73   :  { %216 = vadd.xlane.f32.xlu1 %v215_v15 }
  0x74   :  { %213 = vadd.xlane.f32.xlu0 %v212_v16 }
  0x77   :  { %264 = vadd.xlane.f32.xlu1 %v263_v23 }
  0x78   :  { %261 = vadd.xlane.f32.xlu0 %v260_v24 }
  0x7b   :  { %222 = vadd.xlane.f32.xlu1 %v221_v27 }
  0x7c   :  { %219 = vadd.xlane.f32.xlu0 %v218_v28 }
  0x7f   :  { %270 = vadd.xlane.f32.xlu1 %v269_v31 }
  0x80   :  { %267 = vadd.xlane.f32.xlu0 %v266_v34 }
  0x8c   :  { %v98_v35 = vpop.xlane.xlu1 %97 }
  0x8d   :  { %v50_v38 = vpop.xlane.xlu0 %49  ;;  %v1320_v55 = vmul.f32 0.0625, %v98_v35 }
  0x8e   :  { %v1316_v51 = vmul.f32 0.0625, %v50_v38 }
  0x8f   :  { %v352_v19 = vmul.f32 %v1320_v55, %v1320_v55 }
  0x90   :  { %v101_v39 = vpop.xlane.xlu1 %100  ;;  %v336_v63 = vmul.f32 %v1316_v51, %v1316_v51 }
  0x91   :  { %v53_v42 = vpop.xlane.xlu0 %52  ;;  %v1322_v56 = vmul.f32 0.0625, %v101_v39 }
  0x92   :  { %v1318_v52 = vmul.f32 0.0625, %v53_v42 }
  0x93   :  { %v353_v20 = vmul.f32 %v1322_v56, %v1322_v56 }
  0x94   :  { %v59_v43 = vpop.xlane.xlu1 %58  ;;  %v337_v3 = vmul.f32 %v1318_v52, %v1318_v52 }
  0x95   :  { %v56_v46 = vpop.xlane.xlu0 %55  ;;  %v1332_v23 = vmul.f32 0.0625, %v59_v43 }
  0x96   :  { %v1334_v30 = vmul.f32 0.0625, %v56_v46 }
  0x97   :  { %v339_v39 = vmul.f32 %v1332_v23, %v1332_v23 }
  0x98   :  { %v107_v47 = vpop.xlane.xlu1 %106  ;;  %v338_v46 = vmul.f32 %v1334_v30, %v1334_v30 }
  0x99   :  { %v104_v48 = vpop.xlane.xlu0 %103  ;;  %v1338_v42 = vmul.f32 0.0625, %v107_v47 }
  0x9b   :  { %v355_v47 = vmul.f32 %v1338_v42, %v1338_v42 }
  0x9c   :  { %v181_v59 = vpop.xlane.xlu1 %180 }
  0x9d   :  { %v178_v60 = vpop.xlane.xlu0 %177  ;;  %v305_v7 = vmul.f32 0.0625, %v181_v59  ;;  %v1340_v59 = vmul.f32 0.0625, %v104_v48 }
  0x9e   :  { %v304_v10 = vmul.f32 0.0625, %v178_v60 }
  0x9f   :  { %v369_v15 = vsub.f32 %v305_v7, %v337_v3  ;;  %v354_v48 = vmul.f32 %v1340_v59, %v1340_v59 }
  0xa0   :  { %v368_v16 = vsub.f32 %v304_v10, %v336_v63  ;;  %v229_v24 = vpop.xlane.xlu1 %228 }
  0xa1   :  { %v226_v25 = vpop.xlane.xlu0 %225  ;;  %v401_v26 = vmax.f32 %v369_v15, 0.0  ;;  %v321_v28 = vmul.f32 0.0625, %v229_v24 }
  0xa2   :  { %v400_v27 = vmax.f32 %v368_v16, 0.0  ;;  %v320_v29 = vmul.f32 0.0625, %v226_v25 }
  0xa3   :  { %v465_v31 = vadd.f32 1e-05, %v401_v26  ;;  %v385_v35 = vsub.f32 %v321_v28, %v353_v20 }
  0xa4   :  { %v464_v34 = vadd.f32 1e-05, %v400_v27  ;;  %v384_v38 = vsub.f32 %v320_v29, %v352_v19  ;;  %v187_v43 = vpop.xlane.xlu1 %186 }
  0xa5   :  { %v184_v60 = vpop.xlane.xlu0 %183  ;;  %909 = vrsqrt.f32 %v465_v31  ;;  %v417_v63 = vmax.f32 %v385_v35, 0.0  ;;  %v307_v7 = vmul.f32 0.0625, %v187_v43 }
  0xa6   :  { %v416_v3 = vmax.f32 %v384_v38, 0.0  ;;  %911 = vrsqrt.f32 %v464_v34  ;;  %v306_v10 = vmul.f32 0.0625, %v184_v60 }
  0xa7   :  { %v481_v15 = vadd.f32 1e-05, %v417_v63  ;;  %v371_v19 = vsub.f32 %v307_v7, %v339_v39 }
  0xa8   :  { %v480_v16 = vadd.f32 1e-05, %v416_v3  ;;  %v370_v20 = vsub.f32 %v306_v10, %v338_v46  ;;  %v235_v24 = vpop.xlane.xlu1 %234 }
  0xa9   :  { %v232_v25 = vpop.xlane.xlu0 %231  ;;  %913 = vrsqrt.f32 %v481_v15  ;;  %v403_v26 = vmax.f32 %v371_v19, 0.0  ;;  %v323_v27 = vmul.f32 0.0625, %v235_v24  ;;  %v433_v19 = vsub.f32 %v1015_v5, %v1318_v52 }
  0xaa   :  { %v322_v28 = vmul.f32 0.0625, %v232_v25  ;;  %915 = vrsqrt.f32 %v480_v16  ;;  %v402_v29 = vmax.f32 %v370_v20, 0.0  ;;  %v432_v16 = vsub.f32 %v1001_v1, %v1316_v51 }
  0xab   :  { %v467_v31 = vadd.f32 1e-05, %v403_v26  ;;  %v387_v34 = vsub.f32 %v323_v27, %v355_v47  ;;  %v448_v27 = vsub.f32 %v996_v0, %v1320_v55  ;;  %v434_v0 = vsub.f32 %v1029_v9, %v1334_v30 }
  0xac   :  { %v386_v35 = vsub.f32 %v322_v28, %v354_v48  ;;  %v466_v38 = vadd.f32 1e-05, %v402_v29  ;;  %v65_v39 = vpop.xlane.xlu1 %64  ;;  %v449_v28 = vsub.f32 %v1006_v2, %v1322_v56  ;;  %v451_v56 = vsub.f32 %v1038_v12, %v1338_v42 }
  0xad   :  { %v62_v43 = vpop.xlane.xlu0 %61  ;;  %917 = vrsqrt.f32 %v467_v31  ;;  %v419_v60 = vmax.f32 %v387_v34, 0.0  ;;  %v1357_v34 = vmul.f32 0.0625, %v65_v39  ;;  %v450_v12 = vsub.f32 %v1043_v13, %v1340_v59 }
  0xae   :  { %v418_v63 = vmax.f32 %v386_v35, 0.0  ;;  %919 = vrsqrt.f32 %v466_v38  ;;  %v1359_v35 = vmul.f32 0.0625, %v62_v43 }
  0xaf   :  { %v483_v3 = vadd.f32 1e-05, %v419_v60  ;;  %v435_v60 = vsub.f32 %v1024_v8, %v1332_v23  ;;  %v341_v8 = vmul.f32 %v1357_v34, %v1357_v34 }
  0xb0   :  { %v482_v7 = vadd.f32 1e-05, %v418_v63  ;;  %v113_v46 = vpop.xlane.xlu1 %112  ;;  %v340_v9 = vmul.f32 %v1359_v35, %v1359_v35 }
  0xb1   :  { %v110_v10 = vpop.xlane.xlu0 %109  ;;  %921 = vrsqrt.f32 %v483_v3  ;;  %v1367_v63 = vmul.f32 0.0625, %v113_v46 }
  0xb2   :  { %v910_v15 = vpop.eup %909  ;;  %923 = vrsqrt.f32 %v482_v7  ;;  %v1369_v3 = vmul.f32 0.0625, %v110_v10 }
  0xb3   :  { %v912_v47 = vpop.eup %911  ;;  %v529_v25 = vmul.f32 %v910_v15, %v433_v19 }
  0xb4   :  { %v71_v48 = vpop.xlane.xlu1 %70  ;;  %v528_v24 = vmul.f32 %v912_v47, %v432_v16 }
  0xb5   :  { %v68_v20 = vpop.xlane.xlu0 %67 }
  0xb6   :  { %v914_v26 = vpop.eup %913  ;;  %v560_v29 = vpack.c.bf16 %v529_v25, %v528_v24  ;;  %v357_v24 = vmul.f32 %v1367_v63, %v1367_v63  ;;  %v356_v25 = vmul.f32 %v1369_v3, %v1369_v3 }
  0xb7   :  { %v916_v31 = vpop.eup %915  ;;  %v545_v52 = vmul.f32 %v914_v26, %v449_v28  ;;  %v1382_v26 = vmul.f32 0.0625, %v71_v48 }
  0xb8   :  { %874 = vmatprep.mubr.msk.bf16.mxu0 %vm47_vm0, %v560_v29  ;;  %v119_v1 = vpop.xlane.xlu1 %118  ;;  %v544_v5 = vmul.f32 %v916_v31, %v448_v27 }
  0xb9   :  { %v116_v51 = vpop.xlane.xlu0 %115  ;;  %v343_v48 = vmul.f32 %v1382_v26, %v1382_v26 }
  0xba   :  { %v918_v38 = vpop.eup %917  ;;  %v568_v2 = vpack.c.bf16 %v545_v52, %v544_v5  ;;  %v1385_v52 = vmul.f32 0.0625, %v68_v20 }
  0xbb   :  { %v920_v55 = vpop.eup %919  ;;  %v531_v15 = vmul.f32 %v918_v38, %v435_v60 }
  0xbc   :  { %890 = vmatprep.mubr.msk.bf16.mxu1 %vm47_vm0, %v568_v2  ;;  %v193_v39 = vpop.xlane.xlu1 %192  ;;  %v530_v7 = vmul.f32 %v920_v55, %v434_v0 }
  0xbd   :  { %v190_v43 = vpop.xlane.xlu0 %189  ;;  %v309_v23 = vmul.f32 0.0625, %v193_v39  ;;  %v1391_v39 = vmul.f32 0.0625, %v116_v51 }
  0xbe   :  { %v308_v30 = vmul.f32 0.0625, %v190_v43  ;;  %v922_v16 = vpop.eup %921  ;;  %v561_v42 = vpack.c.bf16 %v531_v15, %v530_v7 }
  0xbf   :  { %v924_v46 = vpop.eup %923  ;;  %v373_v10 = vsub.f32 %v309_v23, %v341_v8  ;;  %v547_v47 = vmul.f32 %v922_v16, %v451_v56  ;;  %v1389_v56 = vmul.f32 0.0625, %v119_v1  ;;  %v358_v51 = vmul.f32 %v1391_v39, %v1391_v39 }
  0xc0   :  { %v372_v19 = vsub.f32 %v308_v30, %v340_v9  ;;  %875 = vmatmul.mubr.msk.bf16.vlgmr.msra.gmra.mxu0 %vm47_vm0, %v561_v42  ;;  %v241_v27 = vpop.xlane.xlu1 %240  ;;  %v546_v29 = vmul.f32 %v924_v46, %v450_v12  ;;  %v342_v9 = vmul.f32 %v1385_v52, %v1385_v52 }
  0xc1   :  { %v238_v28 = vpop.xlane.xlu0 %237  ;;  %v405_v31 = vmax.f32 %v373_v10, 0.0  ;;  %v325_v59 = vmul.f32 0.0625, %v241_v27  ;;  %v359_v1 = vmul.f32 %v1389_v56, %v1389_v56 }
  0xc2   :  { %v404_v13 = vmax.f32 %v372_v19, 0.0  ;;  %v324_v5 = vmul.f32 0.0625, %v238_v28  ;;  %v569_v38 = vpack.c.bf16 %v547_v47, %v546_v29 }
  0xc3   :  { %v469_v60 = vadd.f32 1e-05, %v405_v31  ;;  %v389_v2 = vsub.f32 %v325_v59, %v357_v24 }
  0xc4   :  { %v468_v0 = vadd.f32 1e-05, %v404_v13  ;;  %v388_v55 = vsub.f32 %v324_v5, %v356_v25  ;;  %891 = vmatmul.mubr.msk.bf16.vlgmr.msra.gmra.mxu1 %vm47_vm0, %v569_v38  ;;  %v199_v43 = vpop.xlane.xlu1 %198 }
  0xc5   :  { %v196_v7 = vpop.xlane.xlu0 %195  ;;  %925 = vrsqrt.f32 %v469_v60  ;;  %v421_v15 = vmax.f32 %v389_v2, 0.0  ;;  %v311_v8 = vmul.f32 0.0625, %v199_v43  ;;  %v437_v43 = vsub.f32 %v1076_v32, %v1357_v34 }
  0xc6   :  { %v420_v20 = vmax.f32 %v388_v55, 0.0  ;;  %927 = vrsqrt.f32 %v468_v0  ;;  %v310_v23 = vmul.f32 0.0625, %v196_v7  ;;  %v436_v7 = vsub.f32 %v1081_v33, %v1359_v35 }
  0xc7   :  { %v485_v30 = vadd.f32 1e-05, %v421_v15  ;;  %v375_v12 = vsub.f32 %v311_v8, %v343_v48 }
  0xc8   :  { %v484_v16 = vadd.f32 1e-05, %v420_v20  ;;  %v374_v42 = vsub.f32 %v310_v23, %v342_v9  ;;  %v247_v46 = vpop.xlane.xlu1 %246 }
  0xc9   :  { %v244_v10 = vpop.xlane.xlu0 %243  ;;  %929 = vrsqrt.f32 %v485_v30  ;;  %v407_v19 = vmax.f32 %v375_v12, 0.0  ;;  %v327_v47 = vmul.f32 0.0625, %v247_v46  ;;  %v452_v12 = vsub.f32 %v1095_v37, %v1369_v3 }
  0xca   :  { %v326_v24 = vmul.f32 0.0625, %v244_v10  ;;  %931 = vrsqrt.f32 %v484_v16  ;;  %v406_v25 = vmax.f32 %v374_v42, 0.0  ;;  %v453_v16 = vsub.f32 %v1090_v36, %v1367_v63 }
  0xcb   :  { %v471_v27 = vadd.f32 1e-05, %v407_v19  ;;  %v391_v28 = vsub.f32 %v327_v47, %v359_v1  ;;  %v439_v19 = vsub.f32 %v1104_v40, %v1382_v26  ;;  %v438_v36 = vsub.f32 %v1109_v41, %v1385_v52 }
  0xcc   :  { %v390_v29 = vsub.f32 %v326_v24, %v358_v51  ;;  %v470_v31 = vadd.f32 1e-05, %v406_v25  ;;  %v77_v13 = vpop.xlane.xlu1 %76  ;;  %v455_v3 = vsub.f32 %v1118_v44, %v1389_v56  ;;  %v454_v44 = vsub.f32 %v1123_v45, %v1391_v39 }
  0xcd   :  { %v74_v59 = vpop.xlane.xlu0 %73  ;;  %933 = vrsqrt.f32 %v471_v27  ;;  %v423_v5 = vmax.f32 %v391_v28, 0.0  ;;  %v1409_v42 = vmul.f32 0.0625, %v77_v13 }
  0xce   :  { %v422_v38 = vmax.f32 %v390_v29, 0.0  ;;  %935 = vrsqrt.f32 %v470_v31  ;;  %v1411_v46 = vmul.f32 0.0625, %v74_v59 }
  0xcf   :  { %v487_v60 = vadd.f32 1e-05, %v423_v5  ;;  %v345_v40 = vmul.f32 %v1409_v42, %v1409_v42 }
  0xd0   :  { %v486_v0 = vadd.f32 1e-05, %v422_v38  ;;  %v125_v2 = vpop.xlane.xlu1 %124  ;;  %v344_v41 = vmul.f32 %v1411_v46, %v1411_v46 }
  0xd1   :  { %v122_v55 = vpop.xlane.xlu0 %121  ;;  %937 = vrsqrt.f32 %v487_v60  ;;  %v1419_v47 = vmul.f32 0.0625, %v125_v2 }
  0xd2   :  { %v926_v48 = vpop.eup %925  ;;  %939 = vrsqrt.f32 %v486_v0  ;;  %v1421_v24 = vmul.f32 0.0625, %v122_v55 }
  0xd3   :  { %v928_v15 = vpop.eup %927  ;;  %v533_v23 = vmul.f32 %v926_v48, %v437_v43  ;;  %v361_v60 = vmul.f32 %v1419_v47, %v1419_v47 }
  0xd4   :  { %v83_v20 = vpop.xlane.xlu1 %82  ;;  %v532_v9 = vmul.f32 %v928_v15, %v436_v7  ;;  %v360_v0 = vmul.f32 %v1421_v24, %v1421_v24 }
  0xd5   :  { %v80_v8 = vpop.xlane.xlu0 %79  ;;  %v1434_v2 = vmul.f32 0.0625, %v83_v20 }
  0xd6   :  { %v930_v30 = vpop.eup %929  ;;  %v562_v1 = vpack.c.bf16 %v533_v23, %v532_v9  ;;  %v1437_v9 = vmul.f32 0.0625, %v80_v8 }
  0xd7   :  { %v932_v51 = vpop.eup %931  ;;  %v549_v35 = vmul.f32 %v930_v30, %v453_v16  ;;  %v347_v20 = vmul.f32 %v1434_v2, %v1434_v2 }
  0xd8   :  { %878 = vmatprep.mubr.msk.bf16.mxu0 %vm47_vm0, %v562_v1  ;;  %v131_v32 = vpop.xlane.xlu1 %130  ;;  %v548_v33 = vmul.f32 %v932_v51, %v452_v12 }
  0xd9   :  { %v128_v34 = vpop.xlane.xlu0 %127  ;;  %v1441_v51 = vmul.f32 0.0625, %v131_v32 }
  0xda   :  { %v934_v10 = vpop.eup %933  ;;  %v570_v37 = vpack.c.bf16 %v549_v35, %v548_v33  ;;  %v1443_v33 = vmul.f32 0.0625, %v128_v34 }
  0xdb   :  { %v936_v63 = vpop.eup %935  ;;  %v535_v29 = vmul.f32 %v934_v10, %v439_v19  ;;  %v363_v32 = vmul.f32 %v1441_v51, %v1441_v51 }
  0xdc   :  { %894 = vmatprep.mubr.msk.bf16.mxu1 %vm47_vm0, %v570_v37  ;;  %v205_v25 = vpop.xlane.xlu1 %204  ;;  %v534_v28 = vmul.f32 %v936_v63, %v438_v36  ;;  %v346_v37 = vmul.f32 %v1437_v9, %v1437_v9  ;;  %v362_v34 = vmul.f32 %v1443_v33, %v1443_v33 }
  0xdd   :  { %v202_v27 = vpop.xlane.xlu0 %201  ;;  %v313_v26 = vmul.f32 0.0625, %v205_v25 }
  0xde   :  { %v312_v52 = vmul.f32 0.0625, %v202_v27  ;;  %v938_v31 = vpop.eup %937  ;;  %v563_v56 = vpack.c.bf16 %v535_v29, %v534_v28 }
  0xdf   :  { %v940_v13 = vpop.eup %939  ;;  %v377_v59 = vsub.f32 %v313_v26, %v345_v40  ;;  %v551_v38 = vmul.f32 %v938_v31, %v455_v3 }
  0xe0   :  { %v376_v5 = vsub.f32 %v312_v52, %v344_v41  ;;  %879 = vmatmul.mubr.msk.bf16.gmra.mxu0 %vm47_vm0, %v563_v56  ;;  %v253_v55 = vpop.xlane.xlu1 %252  ;;  %v550_v43 = vmul.f32 %v940_v13, %v454_v44 }
  0xe1   :  { %v250_v48 = vpop.xlane.xlu0 %249  ;;  %v409_v7 = vmax.f32 %v377_v59, 0.0  ;;  %v329_v39 = vmul.f32 0.0625, %v253_v55 }
  0xe2   :  { %v408_v45 = vmax.f32 %v376_v5, 0.0  ;;  %v328_v15 = vmul.f32 0.0625, %v250_v48  ;;  %v571_v23 = vpack.c.bf16 %v551_v38, %v550_v43 }
  0xe3   :  { %v473_v30 = vadd.f32 1e-05, %v409_v7  ;;  %v393_v12 = vsub.f32 %v329_v39, %v361_v60  ;;  %v441_v39 = vsub.f32 %v1159_v4, %v1409_v42 }
  0xe4   :  { %v472_v16 = vadd.f32 1e-05, %v408_v45  ;;  %v392_v1 = vsub.f32 %v328_v15, %v360_v0  ;;  %895 = vmatmul.mubr.msk.bf16.gmra.mxu1 %vm47_vm0, %v571_v23  ;;  %v211_v35 = vpop.xlane.xlu1 %210  ;;  %v440_v15 = vsub.f32 %v1164_v6, %v1411_v46 }
  0xe5   :  { %v208_v10 = vpop.xlane.xlu0 %207  ;;  %941 = vrsqrt.f32 %v473_v30  ;;  %v425_v19 = vmax.f32 %v393_v12, 0.0  ;;  %v315_v36 = vmul.f32 0.0625, %v211_v35  ;;  %v457_v35 = vsub.f32 %v1173_v11, %v1419_v47 }
  0xe6   :  { %v424_v8 = vmax.f32 %v392_v1, 0.0  ;;  %943 = vrsqrt.f32 %v472_v16  ;;  %v314_v63 = vmul.f32 0.0625, %v208_v10  ;;  %v456_v10 = vsub.f32 %v1178_v14, %v1421_v24 }
  0xe7   :  { %v489_v3 = vadd.f32 1e-05, %v425_v19  ;;  %v379_v27 = vsub.f32 %v315_v36, %v347_v20  ;;  %v442_v11 = vsub.f32 %v1192_v18, %v1437_v9  ;;  %v459_v24 = vsub.f32 %v1201_v21, %v1441_v51 }
  0xe8   :  { %v488_v25 = vadd.f32 1e-05, %v424_v8  ;;  %v378_v28 = vsub.f32 %v314_v63, %v346_v37  ;;  %v259_v29 = vpop.xlane.xlu1 %258  ;;  %v458_v21 = vsub.f32 %v1206_v22, %v1443_v33 }
  0xe9   :  { %v256_v40 = vpop.xlane.xlu0 %255  ;;  %945 = vrsqrt.f32 %v489_v3  ;;  %v411_v41 = vmax.f32 %v379_v27, 0.0  ;;  %v331_v26 = vmul.f32 0.0625, %v259_v29  ;;  %v443_v3 = vsub.f32 %v1187_v17, %v1434_v2 }
  0xea   :  { %v330_v52 = vmul.f32 0.0625, %v256_v40  ;;  %947 = vrsqrt.f32 %v488_v25  ;;  %v410_v31 = vmax.f32 %v378_v28, 0.0 }
  0xeb   :  { %v475_v44 = vadd.f32 1e-05, %v411_v41  ;;  %v395_v56 = vsub.f32 %v331_v26, %v363_v32 }
  0xec   :  { %v394_v13 = vsub.f32 %v330_v52, %v362_v34  ;;  %v474_v59 = vadd.f32 1e-05, %v410_v31  ;;  %v89_v5 = vpop.xlane.xlu1 %88 }
  0xed   :  { %v86_v38 = vpop.xlane.xlu0 %85  ;;  %949 = vrsqrt.f32 %v475_v44  ;;  %v427_v60 = vmax.f32 %v395_v56, 0.0  ;;  %v1461_v36 = vmul.f32 0.0625, %v89_v5 }
  0xee   :  { %v426_v0 = vmax.f32 %v394_v13, 0.0  ;;  %951 = vrsqrt.f32 %v474_v59  ;;  %v1463_v37 = vmul.f32 0.0625, %v86_v38 }
  0xef   :  { %v491_v55 = vadd.f32 1e-05, %v427_v60  ;;  %v349_v17 = vmul.f32 %v1461_v36, %v1461_v36 }
  0xf0   :  { %v490_v48 = vadd.f32 1e-05, %v426_v0  ;;  %v137_v43 = vpop.xlane.xlu1 %136  ;;  %v348_v18 = vmul.f32 %v1463_v37, %v1463_v37 }
  0xf1   :  { %v134_v7 = vpop.xlane.xlu0 %133  ;;  %953 = vrsqrt.f32 %v491_v55  ;;  %v1471_v25 = vmul.f32 0.0625, %v137_v43 }
  0xf2   :  { %v942_v45 = vpop.eup %941  ;;  %955 = vrsqrt.f32 %v490_v48  ;;  %v1473_v27 = vmul.f32 0.0625, %v134_v7 }
  0xf3   :  { %v944_v23 = vpop.eup %943  ;;  %v537_v1 = vmul.f32 %v942_v45, %v441_v39  ;;  %v365_v44 = vmul.f32 %v1471_v25, %v1471_v25 }
  0xf4   :  { %v95_v30 = vpop.xlane.xlu1 %94  ;;  %v536_v12 = vmul.f32 %v944_v23, %v440_v15  ;;  %v364_v56 = vmul.f32 %v1473_v27, %v1473_v27 }
  0xf5   :  { %v92_v16 = vpop.xlane.xlu0 %91  ;;  %v1486_v13 = vmul.f32 0.0625, %v95_v30 }
  0xf6   :  { %v946_v20 = vpop.eup %945  ;;  %v564_v19 = vpack.c.bf16 %v537_v1, %v536_v12  ;;  %v1489_v55 = vmul.f32 0.0625, %v92_v16 }
  0xf7   :  { %v948_v8 = vpop.eup %947  ;;  %v553_v46 = vmul.f32 %v946_v20, %v457_v35  ;;  %v351_v15 = vmul.f32 %v1486_v13, %v1486_v13 }
  0xf8   :  { %882 = vmatprep.mubr.msk.bf16.mxu0 %vm47_vm0, %v564_v19  ;;  %v143_v4 = vpop.xlane.xlu1 %142  ;;  %v552_v6 = vmul.f32 %v948_v8, %v456_v10  ;;  %v350_v10 = vmul.f32 %v1489_v55, %v1489_v55 }
  0xf9   :  { %v140_v42 = vpop.xlane.xlu0 %139  ;;  %v1493_v23 = vmul.f32 0.0625, %v143_v4 }
  0xfa   :  { %v950_v63 = vpop.eup %949  ;;  %v572_v14 = vpack.c.bf16 %v553_v46, %v552_v6  ;;  %v1495_v30 = vmul.f32 0.0625, %v140_v42 }
  0xfb   :  { %v952_v47 = vpop.eup %951  ;;  %v539_v29 = vmul.f32 %v950_v63, %v443_v3  ;;  %v367_v4 = vmul.f32 %v1493_v23, %v1493_v23 }
  0xfc   :  { %898 = vmatprep.mubr.msk.bf16.mxu1 %vm47_vm0, %v572_v14  ;;  %v217_v32 = vpop.xlane.xlu1 %216  ;;  %v538_v28 = vmul.f32 %v952_v47, %v442_v11  ;;  %v366_v42 = vmul.f32 %v1495_v30, %v1495_v30 }
  0xfd   :  { %v214_v34 = vpop.xlane.xlu0 %213  ;;  %v317_v2 = vmul.f32 0.0625, %v217_v32 }
  0xfe   :  { %v316_v9 = vmul.f32 0.0625, %v214_v34  ;;  %v954_v40 = vpop.eup %953  ;;  %v565_v51 = vpack.c.bf16 %v539_v29, %v538_v28 }
  0xff   :  { %v956_v41 = vpop.eup %955  ;;  %v381_v26 = vsub.f32 %v317_v2, %v349_v17  ;;  %v555_v31 = vmul.f32 %v954_v40, %v459_v24 }
 0x100   :  { %v380_v52 = vsub.f32 %v316_v9, %v348_v18  ;;  %883 = vmatmul.mubr.msk.bf16.gmra.mxu0 %vm47_vm0, %v565_v51  ;;  %v265_v59 = vpop.xlane.xlu1 %264  ;;  %v554_v38 = vmul.f32 %v956_v41, %v458_v21  ;;  %v445_v21 = vsub.f32 %v1239_v49, %v1461_v36  ;;  %v444_v41 = vsub.f32 %v1244_v50, %v1463_v37 }
 0x101   :  { %v262_v5 = vpop.xlane.xlu0 %261  ;;  %v413_v60 = vmax.f32 %v381_v26, 0.0  ;;  %v333_v33 = vmul.f32 0.0625, %v265_v59  ;;  %v460_v59 = vsub.f32 %v1258_v54, %v1473_v27  ;;  %v447_v50 = vsub.f32 %v1267_v57, %v1486_v13 }
 0x102   :  { %v412_v22 = vmax.f32 %v380_v52, 0.0  ;;  %v332_v0 = vmul.f32 0.0625, %v262_v5  ;;  %v573_v48 = vpack.c.bf16 %v555_v31, %v554_v38  ;;  %v446_v37 = vsub.f32 %v1272_v58, %v1489_v55  ;;  %v1527_v55 = vld [vmem:[%s1691_s2] ss:$0 sm:$0xff] }
 0x103   :  { %v477_v43 = vadd.f32 1e-05, %v413_v60  ;;  %v397_v45 = vsub.f32 %v333_v33, %v365_v44  ;;  %v461_v44 = vsub.f32 %v1253_v53, %v1471_v25  ;;  %v463_v54 = vsub.f32 %v1281_v61, %v1493_v23 }
 0x104   :  { %v476_v7 = vadd.f32 1e-05, %v412_v22  ;;  %v396_v39 = vsub.f32 %v332_v0, %v364_v56  ;;  %899 = vmatmul.mubr.msk.bf16.gmra.mxu1 %vm47_vm0, %v573_v48  ;;  %v223_v12 = vpop.xlane.xlu1 %222  ;;  %v462_v0 = vsub.f32 %v1286_v62, %v1495_v30 }
 0x105   :  { %v220_v1 = vpop.xlane.xlu0 %219  ;;  %957 = vrsqrt.f32 %v477_v43  ;;  %v429_v20 = vmax.f32 %v397_v45, 0.0  ;;  %v319_v35 = vmul.f32 0.0625, %v223_v12 }
 0x106   :  { %v428_v16 = vmax.f32 %v396_v39, 0.0  ;;  %959 = vrsqrt.f32 %v476_v7  ;;  %v318_v19 = vmul.f32 0.0625, %v220_v1 }
 0x107   :  { %v493_v8 = vadd.f32 1e-05, %v429_v20  ;;  %v383_v46 = vsub.f32 %v319_v35, %v351_v15 }
 0x108   :  { %v492_v6 = vadd.f32 1e-05, %v428_v16  ;;  %v382_v63 = vsub.f32 %v318_v19, %v350_v10  ;;  %v271_v3 = vpop.xlane.xlu1 %270 }
 0x109   :  { %v268_v11 = vpop.xlane.xlu0 %267  ;;  %961 = vrsqrt.f32 %v493_v8  ;;  %v415_v14 = vmax.f32 %v383_v46, 0.0  ;;  %v335_v47 = vmul.f32 0.0625, %v271_v3 }
 0x10a   :  { %v334_v24 = vmul.f32 0.0625, %v268_v11  ;;  %963 = vrsqrt.f32 %v492_v6  ;;  %v414_v32 = vmax.f32 %v382_v63, 0.0 }
 0x10b   :  { %v479_v34 = vadd.f32 1e-05, %v415_v14  ;;  %v399_v28 = vsub.f32 %v335_v47, %v367_v4 }
 0x10c   :  { %v398_v29 = vsub.f32 %v334_v24, %v366_v42  ;;  %v478_v17 = vadd.f32 1e-05, %v414_v32 }
 0x10d   :  { %965 = vrsqrt.f32 %v479_v34  ;;  %v431_v18 = vmax.f32 %v399_v28, 0.0 }
 0x10e   :  { %v430_v2 = vmax.f32 %v398_v29, 0.0  ;;  %967 = vrsqrt.f32 %v478_v17 }
 0x10f   :  { %v495_v9 = vadd.f32 1e-05, %v431_v18 }
 0x110   :  { %v494_v40 = vadd.f32 1e-05, %v430_v2 }
 0x111   :  { %969 = vrsqrt.f32 %v495_v9 }
 0x112   :  { %v958_v51 = vpop.eup %957  ;;  %971 = vrsqrt.f32 %v494_v40 }
 0x113   :  { %v960_v26 = vpop.eup %959  ;;  %v541_v52 = vmul.f32 %v958_v51, %v445_v21 }
 0x114   :  { %v540_v31 = vmul.f32 %v960_v26, %v444_v41 }
 0x116   :  { %v962_v56 = vpop.eup %961  ;;  %v566_v5 = vpack.c.bf16 %v541_v52, %v540_v31 }
 0x117   :  { %v964_v38 = vpop.eup %963  ;;  %v557_v60 = vmul.f32 %v962_v56, %v461_v44 }
 0x118   :  { %886 = vmatprep.mubr.msk.bf16.mxu0 %vm47_vm0, %v566_v5  ;;  %v556_v49 = vmul.f32 %v964_v38, %v460_v59 }
 0x11a   :  { %v966_v36 = vpop.eup %965  ;;  %v574_v22 = vpack.c.bf16 %v557_v60, %v556_v49 }
 0x11b   :  { %v968_v33 = vpop.eup %967  ;;  %v543_v53 = vmul.f32 %v966_v36, %v447_v50 }
 0x11c   :  { %902 = vmatprep.mubr.msk.bf16.mxu1 %vm47_vm0, %v574_v22  ;;  %v542_v25 = vmul.f32 %v968_v33, %v446_v37 }
 0x11e   :  { %v970_v27 = vpop.eup %969  ;;  %v567_v48 = vpack.c.bf16 %v543_v53, %v542_v25 }
 0x11f   :  { %v972_v43 = vpop.eup %971  ;;  %v559_v57 = vmul.f32 %v970_v27, %v463_v54 }
 0x120   :  { %887 = vmatmul.mubr.msk.bf16.gmra.mxu0 %vm47_vm0, %v567_v48  ;;  %v558_v13 = vmul.f32 %v972_v43, %v462_v0 }
 0x122   :  { %v575_v58 = vpack.c.bf16 %v559_v57, %v558_v13 }
 0x124   :  { %903 = vmatmul.mubr.msk.bf16.gmra.mxu1 %vm47_vm0, %v575_v58 }
 0x180   :  { %v876_v7 = vpop.f32.mrf.mxu0 }
 0x181   :  { %v682_v61 = vadd.f32 %v876_v7, %v1527_v55 }
 0x182   :  { %v673_v45 = vpop.f32.mrf.mxu0 }
 0x183   :  { %803 = vst.msk [vmem:[%s1692_s3 + $0x10] sm:$0xff] %vm800_vm1, %v682_v61  ;;  %v674_v62 = vadd.f32 %v1527_v55, %v673_v45 }
 0x184   :  { %v877_v39 = vpop.f32.mrf.mxu0  ;;  %v892_v15 = vpop.f32.mrf.mxu1 }
 0x185   :  { %801 = vst.msk [vmem:[%s1692_s3] sm:$0xff] %vm800_vm1, %v674_v62  ;;  %v685_v23 = vadd.f32 %v877_v39, %v1527_v55  ;;  %v746_v30 = vadd.f32 %v892_v15, %v1527_v55 }
 0x186   :  { %v676_v12 = vpop.f32.mrf.mxu0  ;;  %v737_v1 = vpop.f32.mrf.mxu1 }
 0x187   :  { %804 = vst.msk [vmem:[%s1692_s3 + $0x18] sm:$0xff] %vm800_vm1, %v685_v23  ;;  %819 = vst.msk [vmem:[%s1692_s3 + $0x90] sm:$0xff] %vm800_vm1, %v746_v30  ;;  %v677_v20 = vadd.f32 %v1527_v55, %v676_v12  ;;  %v738_v16 = vadd.f32 %v1527_v55, %v737_v1 }
 0x188   :  { %v893_v35 = vpop.f32.mrf.mxu1 }
 0x189   :  { %802 = vst.msk [vmem:[%s1692_s3 + $0x8] sm:$0xff] %vm800_vm1, %v677_v20  ;;  %817 = vst.msk [vmem:[%s1692_s3 + $0x80] sm:$0xff] %vm800_vm1, %v738_v16  ;;  %v749_v10 = vadd.f32 %v893_v35, %v1527_v55 }
 0x18a   :  { %v740_v19 = vpop.f32.mrf.mxu1 }
 0x18b   :  { %820 = vst.msk [vmem:[%s1692_s3 + $0x98] sm:$0xff] %vm800_vm1, %v749_v10  ;;  %v741_v8 = vadd.f32 %v1527_v55, %v740_v19 }
 0x18d   :  { %818 = vst.msk [vmem:[%s1692_s3 + $0x88] sm:$0xff] %vm800_vm1, %v741_v8 }
 0x1a0   :  { %v880_v6 = vpop.f32.mrf.mxu0 }
 0x1a1   :  { %v698_v46 = vadd.f32 %v880_v6, %v1527_v55 }
 0x1a2   :  { %v689_v4 = vpop.f32.mrf.mxu0 }
 0x1a3   :  { %807 = vst.msk [vmem:[%s1692_s3 + $0x30] sm:$0xff] %vm800_vm1, %v698_v46  ;;  %v690_v42 = vadd.f32 %v1527_v55, %v689_v4 }
 0x1a4   :  { %v881_v63 = vpop.f32.mrf.mxu0  ;;  %v896_v3 = vpop.f32.mrf.mxu1 }
 0x1a5   :  { %805 = vst.msk [vmem:[%s1692_s3 + $0x20] sm:$0xff] %vm800_vm1, %v690_v42  ;;  %v701_v11 = vadd.f32 %v881_v63, %v1527_v55  ;;  %v762_v14 = vadd.f32 %v896_v3, %v1527_v55 }
 0x1a6   :  { %v692_v47 = vpop.f32.mrf.mxu0  ;;  %v753_v24 = vpop.f32.mrf.mxu1 }
 0x1a7   :  { %808 = vst.msk [vmem:[%s1692_s3 + $0x38] sm:$0xff] %vm800_vm1, %v701_v11  ;;  %823 = vst.msk [vmem:[%s1692_s3 + $0xb0] sm:$0xff] %vm800_vm1, %v762_v14  ;;  %v693_v32 = vadd.f32 %v1527_v55, %v692_v47  ;;  %v754_v34 = vadd.f32 %v1527_v55, %v753_v24 }
 0x1a8   :  { %v897_v28 = vpop.f32.mrf.mxu1 }
 0x1a9   :  { %806 = vst.msk [vmem:[%s1692_s3 + $0x28] sm:$0xff] %vm800_vm1, %v693_v32  ;;  %821 = vst.msk [vmem:[%s1692_s3 + $0xa0] sm:$0xff] %vm800_vm1, %v754_v34  ;;  %v765_v29 = vadd.f32 %v897_v28, %v1527_v55 }
 0x1aa   :  { %v756_v17 = vpop.f32.mrf.mxu1 }
 0x1ab   :  { %824 = vst.msk [vmem:[%s1692_s3 + $0xb8] sm:$0xff] %vm800_vm1, %v765_v29  ;;  %v757_v18 = vadd.f32 %v1527_v55, %v756_v17 }
 0x1ad   :  { %822 = vst.msk [vmem:[%s1692_s3 + $0xa8] sm:$0xff] %vm800_vm1, %v757_v18 }
 0x1c0   :  { %v884_v2 = vpop.f32.mrf.mxu0 }
 0x1c1   :  { %v714_v9 = vadd.f32 %v884_v2, %v1527_v55 }
 0x1c2   :  { %v705_v40 = vpop.f32.mrf.mxu0 }
 0x1c3   :  { %811 = vst.msk [vmem:[%s1692_s3 + $0x50] sm:$0xff] %vm800_vm1, %v714_v9  ;;  %v706_v21 = vadd.f32 %v1527_v55, %v705_v40 }
 0x1c4   :  { %v885_v51 = vpop.f32.mrf.mxu0  ;;  %v900_v41 = vpop.f32.mrf.mxu1 }
 0x1c5   :  { %809 = vst.msk [vmem:[%s1692_s3 + $0x40] sm:$0xff] %vm800_vm1, %v706_v21  ;;  %v717_v26 = vadd.f32 %v885_v51, %v1527_v55  ;;  %v778_v52 = vadd.f32 %v900_v41, %v1527_v55 }
 0x1c6   :  { %v708_v31 = vpop.f32.mrf.mxu0  ;;  %v769_v44 = vpop.f32.mrf.mxu1 }
 0x1c7   :  { %812 = vst.msk [vmem:[%s1692_s3 + $0x58] sm:$0xff] %vm800_vm1, %v717_v26  ;;  %827 = vst.msk [vmem:[%s1692_s3 + $0xd0] sm:$0xff] %vm800_vm1, %v778_v52  ;;  %v709_v56 = vadd.f32 %v1527_v55, %v708_v31  ;;  %v770_v59 = vadd.f32 %v1527_v55, %v769_v44 }
 0x1c8   :  { %v901_v5 = vpop.f32.mrf.mxu1 }
 0x1c9   :  { %810 = vst.msk [vmem:[%s1692_s3 + $0x48] sm:$0xff] %vm800_vm1, %v709_v56  ;;  %825 = vst.msk [vmem:[%s1692_s3 + $0xc0] sm:$0xff] %vm800_vm1, %v770_v59  ;;  %v781_v38 = vadd.f32 %v901_v5, %v1527_v55 }
 0x1ca   :  { %v772_v60 = vpop.f32.mrf.mxu1 }
 0x1cb   :  { %828 = vst.msk [vmem:[%s1692_s3 + $0xd8] sm:$0xff] %vm800_vm1, %v781_v38  ;;  %v773_v49 = vadd.f32 %v1527_v55, %v772_v60 }
 0x1cd   :  { %826 = vst.msk [vmem:[%s1692_s3 + $0xc8] sm:$0xff] %vm800_vm1, %v773_v49 }
 0x1e0   :  { %v888_v50 = vpop.f32.mrf.mxu0 }
 0x1e1   :  { %v730_v36 = vadd.f32 %v888_v50, %v1527_v55 }
 0x1e2   :  { %v721_v37 = vpop.f32.mrf.mxu0 }
 0x1e3   :  { %815 = vst.msk [vmem:[%s1692_s3 + $0x70] sm:$0xff] %vm800_vm1, %v730_v36  ;;  %v722_v22 = vadd.f32 %v1527_v55, %v721_v37 }
 0x1e4   :  { %v889_v33 = vpop.f32.mrf.mxu0  ;;  %v904_v53 = vpop.f32.mrf.mxu1 }
 0x1e5   :  { %813 = vst.msk [vmem:[%s1692_s3 + $0x60] sm:$0xff] %vm800_vm1, %v722_v22  ;;  %v733_v25 = vadd.f32 %v889_v33, %v1527_v55  ;;  %v794_v54 = vadd.f32 %v904_v53, %v1527_v55 }
 0x1e6   :  { %v724_v27 = vpop.f32.mrf.mxu0  ;;  %v785_v0 = vpop.f32.mrf.mxu1 }
 0x1e7   :  { %816 = vst.msk [vmem:[%s1692_s3 + $0x78] sm:$0xff] %vm800_vm1, %v733_v25  ;;  %831 = vst.msk [vmem:[%s1692_s3 + $0xf0] sm:$0xff] %vm800_vm1, %v794_v54  ;;  %v725_v48 = vadd.f32 %v1527_v55, %v724_v27  ;;  %v786_v43 = vadd.f32 %v1527_v55, %v785_v0 }
 0x1e8   :  { %v905_v57 = vpop.f32.mrf.mxu1 }
 0x1e9   :  { %814 = vst.msk [vmem:[%s1692_s3 + $0x68] sm:$0xff] %vm800_vm1, %v725_v48  ;;  %829 = vst.msk [vmem:[%s1692_s3 + $0xe0] sm:$0xff] %vm800_vm1, %v786_v43  ;;  %v797_v13 = vadd.f32 %v905_v57, %v1527_v55 }
 0x1ea   :  { %v788_v58 = vpop.f32.mrf.mxu1 }
 0x1eb   :  { %832 = vst.msk [vmem:[%s1692_s3 + $0xf8] sm:$0xff] %vm800_vm1, %v797_v13  ;;  %v789_v7 = vadd.f32 %v1527_v55, %v788_v58 }
 0x1ed   :  { %830 = vst.msk [vmem:[%s1692_s3 + $0xe8] sm:$0xff] %vm800_vm1, %v789_v7 }

</bundles_post_ra>
